<compile_context>
chip_gen: v6e
topology: v6e:2x2x1
jax: 0.10.0
libtpu: 0.0.40
codegen_flags: <defaults>
</compile_context>

<pallas_src>
import jax
import jax.numpy as jnp
from jax import lax
from jax.experimental import pallas as pl
from jax.experimental.pallas import tpu as pltpu


def _round_up(n, m):
    return ((n + m - 1) // m) * m


def _cdiv(a, b):
    return (a + b - 1) // b


def styblinski_tang_nn(x):
    """Styblinski-Tang value 0.5*(x^4 - 16 x^2 + 5 x) summed over the last axis."""
    x = jnp.asarray(x)
    if not jnp.issubdtype(x.dtype, jnp.floating):
        x = x.astype(jnp.float32)
    orig_shape = x.shape
    hidden = int(orig_shape[-1])
    rows = 1
    for d in orig_shape[:-1]:
        rows *= int(d)
    out_dtype = x.dtype
    x2d = x.reshape(rows, hidden)
    elem_bytes = x2d.dtype.itemsize

    # ---- tiling -------------------------------------------------------------
    # Up to triple-buffered input stream; keep total input buffers ~12 MiB so
    # the footprint stays well inside v7x's 32 MiB default scoped VMEM (and is
    # already near the measured 85% roofline plateau on v5e/v6e).
    n_bufs = 3
    per_buf_budget = (12 * 1024 * 1024) // n_bufs

    # Hidden tile: keep the whole reduction axis in one block when it fits with
    # the minimum row tile (tr=128); otherwise split hidden into 128-aligned
    # chunks and accumulate across an "arbitrary" grid axis.
    if 128 * hidden * elem_bytes <= per_buf_budget:
        th = hidden
    else:
        th = (per_buf_budget // (128 * elem_bytes)) // 128 * 128
        th = max(128, min(th, _round_up(hidden, 128)))
    n_h = _cdiv(hidden, th)
    mask_hidden_tail = (n_h > 1) and (hidden % th != 0)

    # Row tile: as large as the per-buffer budget allows (128-aligned), but
    # small enough that there are >= ~4 row tiles when rows permit, so both
    # TensorCores get work and DMA/compute overlap exists.
    tr = per_buf_budget // (th * elem_bytes)
    tr = max(128, min(2048, (tr // 128) * 128))
    tr = min(tr, _round_up(max(rows // 4, 128), 128))
    n_r = _cdiv(rows, tr)

    # TODO(synk): for hidden < 128 the lane utilization is hidden/128; packing
    # several rows per 128-lane vreg with a segmented sum would recover VALU
    # throughput if the kernel ever stops being HBM-bound (mainly v7x).

    def kernel(x_ref, o_ref, acc_ref):
        k = pl.program_id(1)

        @pl.when(k == 0)
        def _init():
            acc_ref[...] = jnp.zeros_like(acc_ref)

        xb = x_ref[...].astype(jnp.float32)                 # (tr, th) -> f32
        if mask_hidden_tail:
            # Ragged hidden tail: zero out-of-range columns (poly(0) == 0).
            col = k * th + lax.broadcasted_iota(jnp.int32, xb.shape, 1)
            xb = jnp.where(col < hidden, xb, 0.0)

        x2 = xb * xb
        # Folded Horner form of 0.5*(x^4 - 16 x^2 + 5 x).
        poly = x2 * (0.5 * x2 - 8.0) + 2.5 * xb

        if th % 128 == 0 and th > 128:
            # Two-stage reduction: lane-aligned 128-wide strip adds (VPU),
            # then a single cross-lane reduce (XLU).
            partial = poly[:, 0:128]
            for j in range(1, th // 128):
                partial = partial + poly[:, j * 128:(j + 1) * 128]
            row_sum = jnp.sum(partial, axis=-1, keepdims=True)
        else:
            row_sum = jnp.sum(poly, axis=-1, keepdims=True)

        acc_ref[...] += row_sum                              # (tr, 1) f32

        @pl.when(k == pl.num_programs(1) - 1)
        def _flush():
            o_ref[...] = acc_ref[...].astype(o_ref.dtype)

    in_spec_kwargs = {}
    # Deeper input pipelining (mainly helps on v7x where per-step DMA issue
    # latency is a larger fraction of the ~1 us tile transfer).  Only enable
    # when the grid is deep enough to benefit and the API is available.
    if hasattr(pl, "Buffered") and (n_r * n_h) > n_bufs:
        in_spec_kwargs["pipeline_mode"] = pl.Buffered(n_bufs)

    cost = pl.CostEstimate(
        flops=7 * rows * hidden,
        transcendentals=0,
        bytes_accessed=rows * hidden * elem_bytes + rows * out_dtype.itemsize,
    )

    out2d = pl.pallas_call(
        kernel,
        out_shape=jax.ShapeDtypeStruct((rows, 1), out_dtype),
        grid=(n_r, n_h),
        in_specs=[pl.BlockSpec((tr, th), lambda i, k: (i, k), **in_spec_kwargs)],
        out_specs=pl.BlockSpec((tr, 1), lambda i, k: (i, 0)),
        scratch_shapes=[pltpu.VMEM((tr, 1), jnp.float32)],
        compiler_params=pltpu.CompilerParams(
            dimension_semantics=("parallel", "arbitrary")),
        cost_estimate=cost,
    )(x2d)

    return out2d[:, 0].reshape(orig_shape[:-1])


if __name__ == "__main__":
    # Module has no parameters; just build deterministic inputs.
    key = jax.random.PRNGKey(0)
    batch, seq, hidden = 2, 8, 32
    x = jax.random.normal(key, (batch, seq, hidden), dtype=jnp.float32) * 3.0

    out = styblinski_tang_nn(x)
    jax.block_until_ready(out)

    ref = (0.5 * (x ** 4 - 16.0 * x ** 2 + 5.0 * x)).sum(axis=-1)
    assert out.shape == ref.shape == (batch, seq)
    assert jnp.allclose(out, ref, rtol=1e-5, atol=1e-2), (out, ref)

    # Ragged row count (rows % tr != 0, multiple row tiles) sanity check.
    x2 = jax.random.normal(jax.random.PRNGKey(1), (5, 37, 40), jnp.float32) * 2.0
    out2 = styblinski_tang_nn(x2)
    jax.block_until_ready(out2)
    ref2 = (0.5 * (x2 ** 4 - 16.0 * x2 ** 2 + 5.0 * x2)).sum(axis=-1)
    assert out2.shape == ref2.shape == (5, 37)
    assert jnp.allclose(out2, ref2, rtol=1e-5, atol=1e-2)

    print("KERNEL_OK")
</pallas_src>

<mosaic_0001>
module attributes {stable_mosaic.version = 11 : i64} {
  func.func @kernel(%arg0: i32, %arg1: i32, %arg2: memref<128x32xf32, #tpu.memory_space<vmem>>, %arg3: memref<128x1xf32, #tpu.memory_space<vmem>>, %arg4: memref<128x1xf32, #tpu.memory_space<vmem>>) attributes {dimension_semantics = [#tpu.dimension_semantics<parallel>, #tpu.dimension_semantics<arbitrary>], iteration_bounds = array<i64: 1, 1>, scalar_prefetch = 0 : i64, scratch_operands = 1 : i64, tpu.core_type = #tpu.core_type<tc>, window_params = [{transform_indices = @transform_0, window_bounds = array<i64: 128, 32>}, {transform_indices = @transform_1, window_bounds = array<i64: 128, 1>}]} {
    %c0_i32 = arith.constant 0 : i32
    %0 = arith.cmpi eq, %arg1, %c0_i32 : i32
    %1 = arith.extui %0 : i1 to i32
    %c0_i32_0 = arith.constant 0 : i32
    %2 = arith.cmpi ne, %1, %c0_i32_0 : i32
    scf.if %2 {
      %cst_11 = arith.constant 0.000000e+00 : f32
      %21 = vector.broadcast %cst_11 : f32 to vector<128x1xf32>
      %c0_12 = arith.constant 0 : index
      %c0_13 = arith.constant 0 : index
      %22 = vector.load %arg4[%c0_12, %c0_13] : memref<128x1xf32, #tpu.memory_space<vmem>>, vector<128x1xf32>
      tpu.vector_store %arg4[%c0_12, %c0_13], %21 {strides = array<i32>} : memref<128x1xf32, #tpu.memory_space<vmem>>, vector<128x1xf32>,
    } else {
    }
    %c0 = arith.constant 0 : index
    %c0_1 = arith.constant 0 : index
    %3 = vector.load %arg2[%c0, %c0_1] : memref<128x32xf32, #tpu.memory_space<vmem>>, vector<128x32xf32>
    %4 = arith.mulf %3, %3 : vector<128x32xf32>
    %cst = arith.constant 5.000000e-01 : f32
    %5 = vector.broadcast %cst : f32 to vector<128x32xf32>
    %6 = arith.mulf %5, %4 : vector<128x32xf32>
    %cst_2 = arith.constant 8.000000e+00 : f32
    %7 = vector.broadcast %cst_2 : f32 to vector<128x32xf32>
    %8 = arith.subf %6, %7 : vector<128x32xf32>
    %9 = arith.mulf %4, %8 : vector<128x32xf32>
    %cst_3 = arith.constant 2.500000e+00 : f32
    %10 = vector.broadcast %cst_3 : f32 to vector<128x32xf32>
    %11 = arith.mulf %10, %3 : vector<128x32xf32>
    %12 = arith.addf %9, %11 : vector<128x32xf32>
    %cst_4 = arith.constant dense<0.000000e+00> : vector<128xf32>
    %13 = vector.multi_reduction <add>, %12, %cst_4 [1] : vector<128x32xf32> to vector<128xf32>
    %14 = vector.shape_cast %13 : vector<128xf32> to vector<128x1xf32>
    %c0_5 = arith.constant 0 : index
    %c0_6 = arith.constant 0 : index
    %15 = vector.load %arg4[%c0_5, %c0_6] : memref<128x1xf32, #tpu.memory_space<vmem>>, vector<128x1xf32>
    %16 = arith.addf %15, %14 : vector<128x1xf32>
    %c0_7 = arith.constant 0 : index
    %c0_8 = arith.constant 0 : index
    %17 = vector.load %arg4[%c0_7, %c0_8] : memref<128x1xf32, #tpu.memory_space<vmem>>, vector<128x1xf32>
    tpu.vector_store %arg4[%c0_7, %c0_8], %16 {strides = array<i32>} : memref<128x1xf32, #tpu.memory_space<vmem>>, vector<128x1xf32>,
    %c0_i32_9 = arith.constant 0 : i32
    %18 = arith.cmpi eq, %arg1, %c0_i32_9 : i32
    %19 = arith.extui %18 : i1 to i32
    %c0_i32_10 = arith.constant 0 : i32
    %20 = arith.cmpi ne, %19, %c0_i32_10 : i32
    scf.if %20 {
      %c0_11 = arith.constant 0 : index
      %c0_12 = arith.constant 0 : index
      %21 = vector.load %arg4[%c0_11, %c0_12] : memref<128x1xf32, #tpu.memory_space<vmem>>, vector<128x1xf32>
      %c0_13 = arith.constant 0 : index
      %c0_14 = arith.constant 0 : index
      %22 = vector.load %arg3[%c0_13, %c0_14] : memref<128x1xf32, #tpu.memory_space<vmem>>, vector<128x1xf32>
      tpu.vector_store %arg3[%c0_13, %c0_14], %21 {strides = array<i32>} : memref<128x1xf32, #tpu.memory_space<vmem>>, vector<128x1xf32>,
    } else {
    }
    return
  }
  func.func @transform_0(%arg0: i32, %arg1: i32) -> (i32, i32) {
    %c0_i32 = arith.constant 0 : i32
    return %arg0, %arg1 : i32, i32
  }
  func.func @transform_1(%arg0: i32, %arg1: i32) -> (i32, i32) {
    %c0_i32 = arith.constant 0 : i32
    %c0_i32_0 = arith.constant 0 : i32
    return %arg0, %c0_i32 : i32, i32
  }
}

</mosaic_0001>

<bundles_post_ra>
// kernel: tpu_custom_call.1
= control target key start
LH: loop header
LB: loop body
LE: loop exit
PB: predicated region body
PF: predicated region fallthrough
CT: control target
= control target key end

     0   :  { %6 = vsyncpa [#allocation4], 0  ;;  %s449_s0 = inlined_call_operand.hbm [shape: f32[16,32], index: 0, kind: input, shape index: {}]   ;;  %s450_s1 = inlined_call_operand.vmem [shape: f32[16,1], index: 1, kind: output, shape index: {}]  }
   0x1   :  { %11 = vsyncadd [#allocation4], 1792  ;;  %s376_s6 = smov [#allocation3]  }
   0x2   :  { %s12_s7 = sshll.u32 %s376_s6, 4  ;;  %s13_s7 = int_to_ptr.vmem [resolvable:$true] %s12_s7 }
   0x3   :  { %s362_s8 = scalar_lea.vmem %s13_s7, 256  ;;  %s366_s9 = scalar_lea.vmem %s13_s7, 2048 }
   0x4   :  { %p363_p0 = scmp.ne.s32.totalorder %s13_s7, %s362_s8  ;;  %p367_p1 = scmp.lt.s32.totalorder %s13_s7, %s13_s7 }
   0x5   :  { %p368_p2 = scmp.lt.s32.totalorder %s366_s9, %s362_s8 }
   0x7   :  { %p369_p3 = por %p368_p2, %p367_p1 }
   0x9   :  { %p370_p4 = pnand %p369_p3, %p363_p0 }
   0xb   :  { %373 = shalt.err (!%p370_p4)
}
   0xc   :  { %s377_s10 = smov 128   ;;  %s378_s11 = smov 8  }
   0xd   :  { %18 = dma.hbm_to_vmem [thread:$0]  %s449_s0, 256, %s13_s7, [#allocation4], %s377_s10, %s377_s10, %s378_s11  }
   0xe   :  { %374 = dma.done.wait [#allocation4], 2048  }
   0xf   :  { %375 = vsyncadd [#allocation4], 4294965248  ;;  %vm26_vm0 = vcmask 7168   ;;  %v379_v0 = vmov 0.0   ;;  %v45_v1 = vld [vmem:[#allocation3 + $0x10] sm:$0xff]  ;;  %vm155_vm1 = vcmask 261120  }
  0x10   :  { %29 = vst.msk [vmem:[#allocation2 + $0x10] sm:$0xff] %vm26_vm0, %v379_v0  ;;  %27 = vst.msk [vmem:[#allocation2] sm:$0xff] %vm26_vm0, %v379_v0  ;;  %v43_v2 = vld [vmem:[#allocation3] sm:$0xff]  ;;  %v46_v3 = vld [vmem:[#allocation3 + $0x18] sm:$0xff]  ;;  %v61_v4 = vmul.f32 %v45_v1, %v45_v1  ;;  %v125_v5 = vmul.f32 2.5, %v45_v1 }
  0x11   :  { %28 = vst.msk [vmem:[#allocation2 + $0x8] sm:$0xff] %vm26_vm0, %v379_v0  ;;  %30 = vst.msk [vmem:[#allocation2 + $0x18] sm:$0xff] %vm26_vm0, %v379_v0  ;;  %v59_v6 = vmul.f32 %v43_v2, %v43_v2  ;;  %v123_v7 = vmul.f32 2.5, %v43_v2  ;;  %v44_v8 = vld [vmem:[#allocation3 + $0x8] sm:$0xff]  ;;  %v47_v10 = vld [vmem:[#allocation3 + $0x20] sm:$0xff]  ;;  %v62_v11 = vmul.f32 %v46_v3, %v46_v3  ;;  %v126_v12 = vmul.f32 2.5, %v46_v3 }
  0x12   :  { %31 = vst.msk [vmem:[#allocation2 + $0x20] sm:$0xff] %vm26_vm0, %v379_v0  ;;  %32 = vst.msk [vmem:[#allocation2 + $0x28] sm:$0xff] %vm26_vm0, %v379_v0  ;;  %v48_v9 = vld [vmem:[#allocation3 + $0x28] sm:$0xff]  ;;  %v60_v13 = vmul.f32 %v44_v8, %v44_v8  ;;  %v124_v14 = vmul.f32 2.5, %v44_v8  ;;  %v50_v15 = vld [vmem:[#allocation3 + $0x38] sm:$0xff]  ;;  %v77_v16 = vmul.f32 0.5, %v61_v4  ;;  %v63_v22 = vmul.f32 %v47_v10, %v47_v10 }
  0x13   :  { %33 = vst.msk [vmem:[#allocation2 + $0x30] sm:$0xff] %vm26_vm0, %v379_v0  ;;  %34 = vst.msk [vmem:[#allocation2 + $0x38] sm:$0xff] %vm26_vm0, %v379_v0  ;;  %v75_v17 = vmul.f32 0.5, %v59_v6  ;;  %v64_v18 = vmul.f32 %v48_v9, %v48_v9  ;;  %v128_v19 = vmul.f32 2.5, %v48_v9  ;;  %v78_v20 = vmul.f32 0.5, %v62_v11  ;;  %v49_v28 = vld [vmem:[#allocation3 + $0x30] sm:$0xff] }
  0x14   :  { %35 = vst.msk [vmem:[#allocation2 + $0x40] sm:$0xff] %vm26_vm0, %v379_v0  ;;  %36 = vst.msk [vmem:[#allocation2 + $0x48] sm:$0xff] %vm26_vm0, %v379_v0  ;;  %v76_v21 = vmul.f32 0.5, %v60_v13  ;;  %v127_v23 = vmul.f32 2.5, %v47_v10  ;;  %v336_v24 = vadd.f32 -8.0, %v77_v16  ;;  %v66_v27 = vmul.f32 %v50_v15, %v50_v15  ;;  %v52_v49 = vld [vmem:[#allocation3 + $0x48] sm:$0xff] }
  0x15   :  { %37 = vst.msk [vmem:[#allocation2 + $0x50] sm:$0xff] %vm26_vm0, %v379_v0  ;;  %38 = vst.msk [vmem:[#allocation2 + $0x58] sm:$0xff] %vm26_vm0, %v379_v0  ;;  %v334_v25 = vadd.f32 -8.0, %v75_v17  ;;  %v80_v26 = vmul.f32 0.5, %v64_v18  ;;  %v337_v29 = vadd.f32 -8.0, %v78_v20  ;;  %v79_v31 = vmul.f32 0.5, %v63_v22 }
  0x16   :  { %39 = vst.msk [vmem:[#allocation2 + $0x60] sm:$0xff] %vm26_vm0, %v379_v0  ;;  %40 = vst.msk [vmem:[#allocation2 + $0x68] sm:$0xff] %vm26_vm0, %v379_v0  ;;  %v335_v30 = vadd.f32 -8.0, %v76_v21  ;;  %v130_v32 = vmul.f32 2.5, %v50_v15  ;;  %v109_v33 = vmul.f32 %v336_v24, %v61_v4  ;;  %v82_v36 = vmul.f32 0.5, %v66_v27  ;;  %v51_v54 = vld [vmem:[#allocation3 + $0x40] sm:$0xff] }
  0x17   :  { %41 = vst.msk [vmem:[#allocation2 + $0x70] sm:$0xff] %vm26_vm0, %v379_v0  ;;  %42 = vst.msk [vmem:[#allocation2 + $0x78] sm:$0xff] %vm26_vm0, %v379_v0  ;;  %v107_v34 = vmul.f32 %v334_v25, %v59_v6  ;;  %v339_v35 = vadd.f32 -8.0, %v80_v26  ;;  %v110_v37 = vmul.f32 %v337_v29, %v62_v11  ;;  %v338_v39 = vadd.f32 -8.0, %v79_v31  ;;  %v54_v58 = vld [vmem:[#allocation3 + $0x58] sm:$0xff]  ;;  %v53_v63 = vld [vmem:[#allocation3 + $0x50] sm:$0xff] }
  0x18   :  { %v108_v38 = vmul.f32 %v335_v30, %v60_v13  ;;  %v65_v40 = vmul.f32 %v49_v28, %v49_v28  ;;  %v141_v41 = vadd.f32 %v125_v5, %v109_v33  ;;  %v341_v44 = vadd.f32 -8.0, %v82_v36  ;;  %v56_v3 = vld [vmem:[#allocation3 + $0x68] sm:$0xff]  ;;  %v58_v17 = vld [vmem:[#allocation3 + $0x78] sm:$0xff] }
  0x19   :  { %v139_v42 = vadd.f32 %v123_v7, %v107_v34  ;;  %v112_v43 = vmul.f32 %v339_v35, %v64_v18  ;;  %v142_v45 = vadd.f32 %v126_v12, %v110_v37  ;;  %v111_v47 = vmul.f32 %v338_v39, %v63_v22  ;;  %v55_v12 = vld [vmem:[#allocation3 + $0x60] sm:$0xff]  ;;  %v57_v34 = vld [vmem:[#allocation3 + $0x70] sm:$0xff] }
  0x1a   :  { %v140_v46 = vadd.f32 %v124_v14, %v108_v38  ;;  %v81_v48 = vmul.f32 0.5, %v65_v40  ;;  %v162_v50 = vsel %vm155_vm1, %v141_v41, 0.0  ;;  %v114_v53 = vmul.f32 %v341_v44, %v66_v27 }
  0x1b   :  { %v156_v51 = vsel %vm155_vm1, %v139_v42, 0.0  ;;  %v144_v52 = vadd.f32 %v128_v19, %v112_v43  ;;  %163 = vadd.xlane.f32.xlu1 %v162_v50  ;;  %v165_v55 = vsel %vm155_vm1, %v142_v45, 0.0  ;;  %v143_v56 = vadd.f32 %v127_v23, %v111_v47 }
  0x1c   :  { %157 = vadd.xlane.f32.xlu0 %v156_v51  ;;  %v340_v57 = vadd.f32 -8.0, %v81_v48  ;;  %v159_v59 = vsel %vm155_vm1, %v140_v46, 0.0  ;;  %v146_v60 = vadd.f32 %v130_v32, %v114_v53  ;;  %v129_v61 = vmul.f32 2.5, %v49_v28 }
  0x1d   :  { %v68_v62 = vmul.f32 %v52_v49, %v52_v49  ;;  %v171_v0 = vsel %vm155_vm1, %v144_v52, 0.0  ;;  %v67_v2 = vmul.f32 %v51_v54, %v51_v54  ;;  %v168_v4 = vsel %vm155_vm1, %v143_v56, 0.0 }
  0x1e   :  { %v113_v1 = vmul.f32 %v340_v57, %v65_v40  ;;  %v132_v6 = vmul.f32 2.5, %v52_v49  ;;  %v70_v7 = vmul.f32 %v54_v58, %v54_v58  ;;  %v177_v8 = vsel %vm155_vm1, %v146_v60, 0.0 }
  0x1f   :  { %v84_v5 = vmul.f32 0.5, %v68_v62  ;;  %166 = vadd.xlane.f32.xlu1 %v165_v55  ;;  %v83_v10 = vmul.f32 0.5, %v67_v2  ;;  %v69_v11 = vmul.f32 %v53_v63, %v53_v63  ;;  %v131_v14 = vmul.f32 2.5, %v51_v54 }
  0x20   :  { %160 = vadd.xlane.f32.xlu0 %v159_v59  ;;  %v145_v9 = vadd.f32 %v129_v61, %v113_v1  ;;  %v86_v15 = vmul.f32 0.5, %v70_v7  ;;  %v72_v16 = vmul.f32 %v56_v3, %v56_v3  ;;  %v134_v19 = vmul.f32 2.5, %v54_v58  ;;  %v206_v1 = vld [vmem:[#allocation2 + $0x10] sm:$0xff] }
  0x21   :  { %v343_v13 = vadd.f32 -8.0, %v84_v5  ;;  %v342_v18 = vadd.f32 -8.0, %v83_v10  ;;  %v85_v20 = vmul.f32 0.5, %v69_v11  ;;  %v133_v21 = vmul.f32 2.5, %v53_v63 }
  0x22   :  { %v345_v23 = vadd.f32 -8.0, %v86_v15  ;;  %v88_v24 = vmul.f32 0.5, %v72_v16  ;;  %v71_v25 = vmul.f32 %v55_v12, %v55_v12  ;;  %v174_v26 = vsel %vm155_vm1, %v145_v9, 0.0 }
  0x23   :  { %v116_v22 = vmul.f32 %v343_v13, %v68_v62  ;;  %172 = vadd.xlane.f32.xlu1 %v171_v0  ;;  %v115_v27 = vmul.f32 %v342_v18, %v67_v2  ;;  %v344_v28 = vadd.f32 -8.0, %v85_v20  ;;  %v74_v29 = vmul.f32 %v58_v17, %v58_v17  ;;  %v204_v2 = vld [vmem:[#allocation2] sm:$0xff]  ;;  %v209_v13 = vld [vmem:[#allocation2 + $0x28] sm:$0xff] }
  0x24   :  { %169 = vadd.xlane.f32.xlu0 %v168_v4  ;;  %v118_v31 = vmul.f32 %v345_v23, %v70_v7  ;;  %v347_v32 = vadd.f32 -8.0, %v88_v24  ;;  %v87_v33 = vmul.f32 0.5, %v71_v25  ;;  %v136_v38 = vmul.f32 2.5, %v56_v3  ;;  %v207_v7 = vld [vmem:[#allocation2 + $0x18] sm:$0xff] }
  0x25   :  { %v148_v30 = vadd.f32 %v132_v6, %v116_v22  ;;  %v147_v35 = vadd.f32 %v131_v14, %v115_v27  ;;  %v117_v36 = vmul.f32 %v344_v28, %v69_v11  ;;  %v90_v37 = vmul.f32 0.5, %v74_v29  ;;  %v208_v14 = vld [vmem:[#allocation2 + $0x20] sm:$0xff] }
  0x26   :  { %v346_v39 = vadd.f32 -8.0, %v87_v33  ;;  %v135_v40 = vmul.f32 2.5, %v55_v12  ;;  %v150_v42 = vadd.f32 %v134_v19, %v118_v31  ;;  %v120_v43 = vmul.f32 %v347_v32, %v72_v16  ;;  %v211_v19 = vld [vmem:[#allocation2 + $0x38] sm:$0xff]  ;;  %v212_v28 = vld [vmem:[#allocation2 + $0x40] sm:$0xff] }
  0x27   :  { %178 = vadd.xlane.f32.xlu1 %v177_v8  ;;  %v183_v41 = vsel %vm155_vm1, %v148_v30, 0.0  ;;  %v73_v44 = vmul.f32 %v57_v34, %v57_v34  ;;  %v180_v45 = vsel %vm155_vm1, %v147_v35, 0.0  ;;  %v149_v46 = vadd.f32 %v133_v21, %v117_v36  ;;  %v205_v8 = vld [vmem:[#allocation2 + $0x8] sm:$0xff]  ;;  %v210_v21 = vld [vmem:[#allocation2 + $0x30] sm:$0xff]  ;;  %v215_v33 = vld [vmem:[#allocation2 + $0x58] sm:$0xff] }
  0x28   :  { %175 = vadd.xlane.f32.xlu0 %v174_v26  ;;  %v119_v47 = vmul.f32 %v346_v39, %v71_v25  ;;  %v349_v48 = vadd.f32 -8.0, %v90_v37  ;;  %v189_v50 = vsel %vm155_vm1, %v150_v42, 0.0  ;;  %v152_v51 = vadd.f32 %v136_v38, %v120_v43  ;;  %v213_v26 = vld [vmem:[#allocation2 + $0x48] sm:$0xff] }
  0x29   :  { %v89_v49 = vmul.f32 0.5, %v73_v44  ;;  %v138_v52 = vmul.f32 2.5, %v58_v17  ;;  %v186_v54 = vsel %vm155_vm1, %v149_v46, 0.0  ;;  %v137_v57 = vmul.f32 2.5, %v57_v34  ;;  %v214_v34 = vld [vmem:[#allocation2 + $0x50] sm:$0xff] }
  0x2a   :  { %v151_v55 = vadd.f32 %v135_v40, %v119_v47  ;;  %v122_v56 = vmul.f32 %v349_v48, %v74_v29  ;;  %v195_v59 = vsel %vm155_vm1, %v152_v51, 0.0  ;;  %v217_v40 = vld [vmem:[#allocation2 + $0x68] sm:$0xff]  ;;  %v219_v47 = vld [vmem:[#allocation2 + $0x78] sm:$0xff]  ;;  %v218_v48 = vld [vmem:[#allocation2 + $0x70] sm:$0xff] }
  0x2b   :  { %184 = vadd.xlane.f32.xlu1 %v183_v41  ;;  %v348_v53 = vadd.f32 -8.0, %v89_v49  ;;  %v216_v41 = vld [vmem:[#allocation2 + $0x60] sm:$0xff] }
  0x2c   :  { %181 = vadd.xlane.f32.xlu0 %v180_v45  ;;  %v192_v60 = vsel %vm155_vm1, %v151_v55, 0.0  ;;  %v154_v61 = vadd.f32 %v138_v52, %v122_v56 }
  0x2d   :  { %v121_v58 = vmul.f32 %v348_v53, %v73_v44 }
  0x2e   :  { %v201_v63 = vsel %vm155_vm1, %v154_v61, 0.0 }
  0x2f   :  { %190 = vadd.xlane.f32.xlu1 %v189_v50  ;;  %v153_v62 = vadd.f32 %v137_v57, %v121_v58 }
  0x30   :  { %187 = vadd.xlane.f32.xlu0 %v186_v54 }
  0x31   :  { %v198_v0 = vsel %vm155_vm1, %v153_v62, 0.0 }
  0x33   :  { %196 = vadd.xlane.f32.xlu1 %v195_v59 }
  0x34   :  { %193 = vadd.xlane.f32.xlu0 %v192_v60 }
  0x37   :  { %202 = vadd.xlane.f32.xlu1 %v201_v63 }
  0x38   :  { %199 = vadd.xlane.f32.xlu0 %v198_v0 }
  0xa4   :  { %v164_v3 = vpop.xlane.xlu1 %163 }
  0xa5   :  { %v158_v4 = vpop.xlane.xlu0 %157  ;;  %v222_v5 = vadd.f32 %v206_v1, %v164_v3 }
  0xa6   :  { %v220_v6 = vadd.f32 %v204_v2, %v158_v4 }
  0xa7   :  { %239 = vst.msk [vmem:[#allocation2 + $0x10] sm:$0xff] %vm26_vm0, %v222_v5 }
  0xa8   :  { %237 = vst.msk [vmem:[#allocation2] sm:$0xff] %vm26_vm0, %v220_v6  ;;  %v167_v9 = vpop.xlane.xlu1 %166 }
  0xa9   :  { %v161_v10 = vpop.xlane.xlu0 %160  ;;  %v223_v11 = vadd.f32 %v207_v7, %v167_v9 }
  0xaa   :  { %v221_v12 = vadd.f32 %v205_v8, %v161_v10 }
  0xab   :  { %240 = vst.msk [vmem:[#allocation2 + $0x18] sm:$0xff] %vm26_vm0, %v223_v11 }
  0xac   :  { %238 = vst.msk [vmem:[#allocation2 + $0x8] sm:$0xff] %vm26_vm0, %v221_v12  ;;  %v173_v15 = vpop.xlane.xlu1 %172 }
  0xad   :  { %v170_v16 = vpop.xlane.xlu0 %169  ;;  %v225_v17 = vadd.f32 %v209_v13, %v173_v15 }
  0xae   :  { %v224_v18 = vadd.f32 %v208_v14, %v170_v16 }
  0xaf   :  { %v256_v20 = vld [vmem:[#allocation2] sm:$0xff]  ;;  %242 = vst.msk [vmem:[#allocation2 + $0x28] sm:$0xff] %vm26_vm0, %v225_v17 }
  0xb0   :  { %272 = vst.msk [vmem:[#allocation5] sm:$0xff] %vm26_vm0, %v256_v20  ;;  %241 = vst.msk [vmem:[#allocation2 + $0x20] sm:$0xff] %vm26_vm0, %v224_v18  ;;  %v179_v22 = vpop.xlane.xlu1 %178 }
  0xb1   :  { %v176_v23 = vpop.xlane.xlu0 %175  ;;  %v227_v24 = vadd.f32 %v211_v19, %v179_v22 }
  0xb2   :  { %v226_v25 = vadd.f32 %v210_v21, %v176_v23 }
  0xb3   :  { %v257_v27 = vld [vmem:[#allocation2 + $0x8] sm:$0xff]  ;;  %244 = vst.msk [vmem:[#allocation2 + $0x38] sm:$0xff] %vm26_vm0, %v227_v24 }
  0xb4   :  { %273 = vst.msk [vmem:[#allocation5 + $0x8] sm:$0xff] %vm26_vm0, %v257_v27  ;;  %243 = vst.msk [vmem:[#allocation2 + $0x30] sm:$0xff] %vm26_vm0, %v226_v25  ;;  %v185_v29 = vpop.xlane.xlu1 %184 }
  0xb5   :  { %v182_v30 = vpop.xlane.xlu0 %181  ;;  %v229_v31 = vadd.f32 %v213_v26, %v185_v29 }
  0xb6   :  { %v228_v32 = vadd.f32 %v212_v28, %v182_v30 }
  0xb7   :  { %v320_v35 = vld [vmem:[#allocation5] sm:$0xff]  ;;  %246 = vst.msk [vmem:[#allocation2 + $0x48] sm:$0xff] %vm26_vm0, %v229_v31 }
  0xb8   :  { %321 = vst [vmem:[%s450_s1] sm:$0xff] %v320_v35  ;;  %245 = vst.msk [vmem:[#allocation2 + $0x40] sm:$0xff] %vm26_vm0, %v228_v32  ;;  %v191_v36 = vpop.xlane.xlu1 %190 }
  0xb9   :  { %v188_v37 = vpop.xlane.xlu0 %187  ;;  %v231_v38 = vadd.f32 %v215_v33, %v191_v36 }
  0xba   :  { %v230_v39 = vadd.f32 %v214_v34, %v188_v37 }
  0xbb   :  { %v322_v42 = vld [vmem:[#allocation5 + $0x8] sm:$0xff]  ;;  %248 = vst.msk [vmem:[#allocation2 + $0x58] sm:$0xff] %vm26_vm0, %v231_v38 }
  0xbc   :  { %323 = vst [vmem:[%s450_s1 + $0x8] sm:$0xff] %v322_v42  ;;  %247 = vst.msk [vmem:[#allocation2 + $0x50] sm:$0xff] %vm26_vm0, %v230_v39  ;;  %v197_v43 = vpop.xlane.xlu1 %196 }
  0xbd   :  { %v194_v44 = vpop.xlane.xlu0 %193  ;;  %v233_v45 = vadd.f32 %v217_v40, %v197_v43 }
  0xbe   :  { %v232_v46 = vadd.f32 %v216_v41, %v194_v44 }
  0xbf   :  { %250 = vst.msk [vmem:[#allocation2 + $0x68] sm:$0xff] %vm26_vm0, %v233_v45 }
  0xc0   :  { %249 = vst.msk [vmem:[#allocation2 + $0x60] sm:$0xff] %vm26_vm0, %v232_v46  ;;  %v203_v49 = vpop.xlane.xlu1 %202 }
  0xc1   :  { %v200_v50 = vpop.xlane.xlu0 %199  ;;  %v235_v51 = vadd.f32 %v219_v47, %v203_v49 }
  0xc2   :  { %v234_v52 = vadd.f32 %v218_v48, %v200_v50 }
  0xc3   :  { %252 = vst.msk [vmem:[#allocation2 + $0x78] sm:$0xff] %vm26_vm0, %v235_v51 }
  0xc4   :  { %251 = vst.msk [vmem:[#allocation2 + $0x70] sm:$0xff] %vm26_vm0, %v234_v52 }
  0xc5   :  { %329 = vsyncpa [#allocation4], 1 }

</bundles_post_ra>
